<compile_context>
chip_gen: v7x
topology: tpu7x:2x2x1
jax: 0.10.0
libtpu: 0.0.40
codegen_flags: <defaults>
</compile_context>

<pallas_src>
import jax
import jax.numpy as jnp
from jax.experimental import pallas as pl
from jax.experimental.pallas import tpu as pltpu


def _pick_group(bh, max_group=16):
    """Largest divisor of bh <= max_group, preferring >=2 grid steps (megacore/v7x)."""
    divisors = [g for g in range(1, bh + 1) if bh % g == 0 and g <= max_group]
    multi = [g for g in divisors if bh // g >= 2]
    return max(multi) if multi else max(divisors)


def _make_kernel(inv_temp, with_mask, with_attn):
    def kernel(*refs):
        if with_mask:
            q_ref, k_ref, v_ref, mask_ref = refs[:4]
            outs = refs[4:]
        else:
            q_ref, k_ref, v_ref = refs[:3]
            mask_ref = None
            outs = refs[3:]
        out_ref = outs[0]
        attn_ref = outs[1] if with_attn else None

        q = q_ref[...]  # (G, Lq, Dk), native dtype -> MXU directly
        k = k_ref[...]  # (G, Lk, Dk)
        v = v_ref[...]  # (G, Lk, Dv)

        # Contract the last dims of q and k (no k transpose / XLU relayout),
        # accumulate in f32 on the MXU. Scale after the matmul in f32.
        s = jnp.einsum("gqd,gkd->gqk", q, k, preferred_element_type=jnp.float32)
        s = s * jnp.float32(inv_temp)

        if mask_ref is not None:
            # mask block is (G, mq, mk) with mq in {1, Lq}, mk in {1, Lk};
            # broadcast against s inside the kernel (free VPU compare+select).
            s = jnp.where(mask_ref[...] == 0, jnp.float32(-1e9), s)

        # numerically-stable softmax over the last dim, in f32
        m = jnp.max(s, axis=-1, keepdims=True)
        p = jnp.exp(s - m)
        p = p * pl.reciprocal(jnp.sum(p, axis=-1, keepdims=True))

        if attn_ref is not None:
            attn_ref[...] = p.astype(attn_ref.dtype)

        out = jnp.einsum(
            "gqk,gkd->gqd", p.astype(v.dtype), v, preferred_element_type=jnp.float32
        )
        out_ref[...] = out.astype(out_ref.dtype)

    return kernel


def scaled_dot_product_attention(q, k, v, temperature, mask=None, return_attn=True):
    """q: (B,H,Lq,Dk), k: (B,H,Lk,Dk), v: (B,H,Lk,Dv), mask broadcastable to (B,H,Lq,Lk)."""
    B, H, Lq, Dk = q.shape
    Lk = k.shape[2]
    Dv = v.shape[3]
    BH = B * H
    G = _pick_group(BH)

    qf = q.reshape(BH, Lq, Dk)
    kf = k.reshape(BH, Lk, Dk)
    vf = v.reshape(BH, Lk, Dv)

    inv_temp = float(1.0 / temperature)

    in_specs = [
        pl.BlockSpec((G, Lq, Dk), lambda i: (i, 0, 0)),
        pl.BlockSpec((G, Lk, Dk), lambda i: (i, 0, 0)),
        pl.BlockSpec((G, Lk, Dv), lambda i: (i, 0, 0)),
    ]
    args = [qf, kf, vf]

    with_mask = mask is not None
    mq = mk = 1
    if with_mask:
        mask4 = jnp.asarray(mask)
        if mask4.ndim < 4:
            mask4 = mask4.reshape((1,) * (4 - mask4.ndim) + mask4.shape)
        mq, mk = mask4.shape[2], mask4.shape[3]
        # Keep mask compact: only broadcast over batch/head, carry int8 (0/1),
        # and let the kernel broadcast over Lq/Lk.
        mask4 = jnp.broadcast_to(mask4, (B, H, mq, mk))
        mf = (mask4 != 0).astype(jnp.int8).reshape(BH, mq, mk)
        in_specs.append(pl.BlockSpec((G, mq, mk), lambda i: (i, 0, 0)))
        args.append(mf)

    out_specs = [pl.BlockSpec((G, Lq, Dv), lambda i: (i, 0, 0))]
    out_shape = [jax.ShapeDtypeStruct((BH, Lq, Dv), q.dtype)]
    if return_attn:
        out_specs.append(pl.BlockSpec((G, Lq, Lk), lambda i: (i, 0, 0)))
        out_shape.append(jax.ShapeDtypeStruct((BH, Lq, Lk), q.dtype))

    # Rough VMEM budget for double-buffered blocks (stay within v7x's 64 MiB).
    bpe = max(jnp.dtype(q.dtype).itemsize, 4)
    blk_bytes = G * (Lq * Dk + Lk * Dk + Lk * Dv + Lq * Dv + Lq * Lk) * bpe
    if with_mask:
        blk_bytes += G * mq * mk
    vmem_limit = int(min(max(4 * blk_bytes, 32 * 1024 * 1024), 64 * 1024 * 1024))

    kernel = _make_kernel(inv_temp, with_mask, return_attn)

    results = pl.pallas_call(
        kernel,
        grid=(BH // G,),
        in_specs=in_specs,
        out_specs=out_specs,
        out_shape=out_shape,
        compiler_params=pltpu.CompilerParams(
            dimension_semantics=("parallel",),
            vmem_limit_bytes=vmem_limit,
        ),
    )(*args)

    out_f = results[0].reshape(B, H, Lq, Dv)
    if return_attn:
        attn_f = results[1].reshape(B, H, Lq, Lk)
        return out_f, attn_f
    return out_f


def _reference(q, k, v, temperature, mask=None):
    attn = jnp.einsum("bhqd,bhkd->bhqk", q / temperature, k)
    if mask is not None:
        attn = jnp.where(mask == 0, -1e9, attn)
    attn = jax.nn.softmax(attn, axis=-1)
    out = jnp.einsum("bhqk,bhkd->bhqd", attn, v)
    return out, attn


if __name__ == "__main__":
    key = jax.random.PRNGKey(0)
    kq, kk, kv, km = jax.random.split(key, 4)

    B, H, Lq, Lk, D = 2, 4, 8, 8, 32
    temperature = float(D) ** 0.5

    q = jax.random.normal(kq, (B, H, Lq, D), dtype=jnp.float32)
    k = jax.random.normal(kk, (B, H, Lk, D), dtype=jnp.float32)
    v = jax.random.normal(kv, (B, H, Lk, D), dtype=jnp.float32)
    # broadcastable key-padding mask
    mask = (jax.random.uniform(km, (B, 1, 1, Lk)) > 0.2).astype(jnp.int32)

    # no-mask path
    out0, attn0 = scaled_dot_product_attention(q, k, v, temperature, mask=None)
    out0 = jax.block_until_ready(out0)
    ref_out0, ref_attn0 = _reference(q, k, v, temperature, mask=None)

    # masked path
    out1, attn1 = scaled_dot_product_attention(q, k, v, temperature, mask=mask)
    out1 = jax.block_until_ready(out1)
    ref_out1, ref_attn1 = _reference(q, k, v, temperature, mask=mask)

    # output-only path (attn writeback elided)
    out2 = scaled_dot_product_attention(q, k, v, temperature, mask=mask, return_attn=False)
    out2 = jax.block_until_ready(out2)

    assert jnp.allclose(out0, ref_out0, atol=1e-5, rtol=1e-5)
    assert jnp.allclose(attn0, ref_attn0, atol=1e-5, rtol=1e-5)
    assert jnp.allclose(out1, ref_out1, atol=1e-5, rtol=1e-5)
    assert jnp.allclose(attn1, ref_attn1, atol=1e-5, rtol=1e-5)
    assert jnp.allclose(out2, ref_out1, atol=1e-5, rtol=1e-5)

    print("KERNEL_OK")
</pallas_src>

<mosaic_0001>
module attributes {stable_mosaic.version = 11 : i64} {
  func.func @kernel(%arg0: i32, %arg1: memref<4x8x32xf32, #tpu.memory_space<vmem>>, %arg2: memref<4x8x32xf32, #tpu.memory_space<vmem>>, %arg3: memref<4x8x32xf32, #tpu.memory_space<vmem>>, %arg4: memref<4x8x32xf32, #tpu.memory_space<vmem>>, %arg5: memref<4x8x8xf32, #tpu.memory_space<vmem>>) attributes {dimension_semantics = [#tpu.dimension_semantics<parallel>], iteration_bounds = array<i64: 2>, scalar_prefetch = 0 : i64, scratch_operands = 0 : i64, tpu.core_type = #tpu.core_type<tc>, window_params = [{transform_indices = @transform_0, window_bounds = array<i64: 4, 8, 32>}, {transform_indices = @transform_1, window_bounds = array<i64: 4, 8, 32>}, {transform_indices = @transform_2, window_bounds = array<i64: 4, 8, 32>}, {transform_indices = @transform_3, window_bounds = array<i64: 4, 8, 32>}, {transform_indices = @transform_4, window_bounds = array<i64: 4, 8, 8>}]} {
    %c0 = arith.constant 0 : index
    %c0_0 = arith.constant 0 : index
    %c0_1 = arith.constant 0 : index
    %0 = vector.load %arg1[%c0, %c0_0, %c0_1] : memref<4x8x32xf32, #tpu.memory_space<vmem>>, vector<4x8x32xf32>
    %c0_2 = arith.constant 0 : index
    %c0_3 = arith.constant 0 : index
    %c0_4 = arith.constant 0 : index
    %1 = vector.load %arg2[%c0_2, %c0_3, %c0_4] : memref<4x8x32xf32, #tpu.memory_space<vmem>>, vector<4x8x32xf32>
    %c0_5 = arith.constant 0 : index
    %c0_6 = arith.constant 0 : index
    %c0_7 = arith.constant 0 : index
    %2 = vector.load %arg3[%c0_5, %c0_6, %c0_7] : memref<4x8x32xf32, #tpu.memory_space<vmem>>, vector<4x8x32xf32>
    "tpu.trace_start"() <{level = 10 : i32, message = "gqd,gkd->gqk"}> : () -> ()
    %cst = arith.constant dense<0.000000e+00> : vector<4x8x8xf32>
    %3 = tpu.matmul %0, %1, %cst {dimension_numbers = #tpu.dot_dimension_numbers<[2], [2], [1], [1], [0, 0, 0, 1, 1, 1], [0], [0]>} : vector<4x8x32xf32>, vector<4x8x32xf32>, vector<4x8x8xf32> -> vector<4x8x8xf32>
    "tpu.trace_stop"() : () -> ()
    %cst_8 = arith.constant 0.176776692 : f32
    %4 = vector.broadcast %cst_8 : f32 to vector<4x8x8xf32>
    %5 = arith.mulf %3, %4 : vector<4x8x8xf32>
    %cst_9 = arith.constant dense<0xFF800000> : vector<4x8xf32>
    %6 = vector.multi_reduction <maximumf>, %5, %cst_9 [2] : vector<4x8x8xf32> to vector<4x8xf32>
    %7 = vector.shape_cast %6 : vector<4x8xf32> to vector<4x8x1xf32>
    %8 = vector.broadcast %7 : vector<4x8x1xf32> to vector<4x8x8xf32>
    %9 = arith.subf %5, %8 : vector<4x8x8xf32>
    %10 = math.exp %9 : vector<4x8x8xf32>
    %cst_10 = arith.constant dense<0.000000e+00> : vector<4x8xf32>
    %11 = vector.multi_reduction <add>, %10, %cst_10 [2] : vector<4x8x8xf32> to vector<4x8xf32>
    %12 = vector.shape_cast %11 : vector<4x8xf32> to vector<4x8x1xf32>
    %13 = tpu.reciprocal %12 : vector<4x8x1xf32> -> vector<4x8x1xf32>
    %14 = vector.broadcast %13 : vector<4x8x1xf32> to vector<4x8x8xf32>
    %15 = arith.mulf %10, %14 : vector<4x8x8xf32>
    %c0_11 = arith.constant 0 : index
    %c0_12 = arith.constant 0 : index
    %c0_13 = arith.constant 0 : index
    %16 = vector.load %arg5[%c0_11, %c0_12, %c0_13] : memref<4x8x8xf32, #tpu.memory_space<vmem>>, vector<4x8x8xf32>
    tpu.vector_store %arg5[%c0_11, %c0_12, %c0_13], %15 {strides = array<i32>} : memref<4x8x8xf32, #tpu.memory_space<vmem>>, vector<4x8x8xf32>,
    "tpu.trace_start"() <{level = 10 : i32, message = "gqk,gkd->gqd"}> : () -> ()
    %cst_14 = arith.constant dense<0.000000e+00> : vector<4x8x32xf32>
    %17 = tpu.matmul %15, %2, %cst_14 {dimension_numbers = #tpu.dot_dimension_numbers<[2], [1], [1], [2], [0, 0, 0, 1, 1, 2], [0], [0]>} : vector<4x8x8xf32>, vector<4x8x32xf32>, vector<4x8x32xf32> -> vector<4x8x32xf32>
    "tpu.trace_stop"() : () -> ()
    %c0_15 = arith.constant 0 : index
    %c0_16 = arith.constant 0 : index
    %c0_17 = arith.constant 0 : index
    %18 = vector.load %arg4[%c0_15, %c0_16, %c0_17] : memref<4x8x32xf32, #tpu.memory_space<vmem>>, vector<4x8x32xf32>
    tpu.vector_store %arg4[%c0_15, %c0_16, %c0_17], %17 {strides = array<i32>} : memref<4x8x32xf32, #tpu.memory_space<vmem>>, vector<4x8x32xf32>,
    return
  }
  func.func @transform_0(%arg0: i32) -> (i32, i32, i32) {
    %c0_i32 = arith.constant 0 : i32
    %c0_i32_0 = arith.constant 0 : i32
    %c0_i32_1 = arith.constant 0 : i32
    return %arg0, %c0_i32, %c0_i32_0 : i32, i32, i32
  }
  func.func @transform_1(%arg0: i32) -> (i32, i32, i32) {
    %c0_i32 = arith.constant 0 : i32
    %c0_i32_0 = arith.constant 0 : i32
    %c0_i32_1 = arith.constant 0 : i32
    return %arg0, %c0_i32, %c0_i32_0 : i32, i32, i32
  }
  func.func @transform_2(%arg0: i32) -> (i32, i32, i32) {
    %c0_i32 = arith.constant 0 : i32
    %c0_i32_0 = arith.constant 0 : i32
    %c0_i32_1 = arith.constant 0 : i32
    return %arg0, %c0_i32, %c0_i32_0 : i32, i32, i32
  }
  func.func @transform_3(%arg0: i32) -> (i32, i32, i32) {
    %c0_i32 = arith.constant 0 : i32
    %c0_i32_0 = arith.constant 0 : i32
    %c0_i32_1 = arith.constant 0 : i32
    return %arg0, %c0_i32, %c0_i32_0 : i32, i32, i32
  }
  func.func @transform_4(%arg0: i32) -> (i32, i32, i32) {
    %c0_i32 = arith.constant 0 : i32
    %c0_i32_0 = arith.constant 0 : i32
    %c0_i32_1 = arith.constant 0 : i32
    return %arg0, %c0_i32, %c0_i32_0 : i32, i32, i32
  }
}

</mosaic_0001>

<bundles_post_ra>
// kernel: tpu_custom_call.1
= control target key start
LH: loop header
LB: loop body
LE: loop exit
PB: predicated region body
PF: predicated region fallthrough
CT: control target
= control target key end

     0   :  { %s1931_s0 = inlined_call_operand.hbm [shape: f32[8,8,32], index: 0, kind: input, shape index: {}]   ;;  %s1932_s1 = inlined_call_operand.hbm [shape: f32[8,8,32], index: 1, kind: input, shape index: {}]   ;;  %s1933_s2 = inlined_call_operand.hbm [shape: f32[8,8,32], index: 2, kind: input, shape index: {}]   ;;  %s1934_s3 = inlined_call_operand.hbm [shape: f32[8,8,32], index: 3, kind: output, shape index: {0}]   ;;  %s1935_s4 = inlined_call_operand.hbm [shape: f32[8,8,8], index: 4, kind: output, shape index: {1}]  }
   0x1   :  { %1942 = sst [smem:[#allocation15_spill]] %s1931_s0 }
   0x2   :  { %1943 = sst [smem:[#allocation16_spill]] %s1932_s1 }
   0x3   :  { %10 = vsyncpa [#allocation3], 0 }
   0x4   :  { %12 = vsyncpa [#allocation3 + $0x1], 0 }
   0x5   :  { %13 = vsyncpa [#allocation6], 0 }
   0x6   :  { %15 = vsyncpa [#allocation6 + $0x1], 0 }
   0x7   :  { %16 = vsyncpa [#allocation4], 0 }
   0x8   :  { %18 = vsyncpa [#allocation4 + $0x1], 0 }
   0x9   :  { %19 = vsyncpa [#allocation10], 0 }
   0xa   :  { %21 = vsyncpa [#allocation10 + $0x1], 0  ;;  %s1570_s15 = smov 0   ;;  %s1572_s16 = smov 0  }
   0xb   :  { %s1574_s17 = smov 0   ;;  %s1576_s18 = smov 0  }
   0xc LB: > { %s1591_s19 = sadd.s32 4294967295, %s1532_s18   ;;  %s1158_s20 = sadd.s32 4294967294, %s1532_s18   ;;  %s1532_s18 = sphi %s1576_s18, %s1963_s18   ;;  %s1528_s17 = sphi %s1574_s17, %s1962_s17   ;;  %s1524_s16 = sphi %s1572_s16, %s1961_s16   ;;  %s1520_s15 = sphi %s1570_s15, %s1960_s15  }
   0xd   : > { %s1595_s21 = sadd.s32 1, %s1532_s18   ;;  %s34_s22 = sadd.s32 1, %s1528_s17 }
   0xe   : > { %s31_s23 = ssub.s32 %s1532_s18, %s1595_s21  ;;  %p41_p0 = scmp.ne.s32.totalorder %s1528_s17, %s1524_s16 }
   0xf   : > { %p32_p1 = scmp.eq.s32.totalorder %s31_s23, 0  ;;  %p42_p2 = scmp.eq.s32.totalorder %s1532_s18, 0 }
  0x10   : > { %p47_p3 = scmp.ne.s32.totalorder %s1524_s16, %s1520_s15  ;;  %p48_p4 = scmp.eq.s32.totalorder %s1591_s19, 0 }
  0x11   : > { %s1607_s24 = scalar_select %p32_p1, %s1528_s17, %s34_s22  }
  0x12   : > { %p43_p5 = por %p42_p2, %p41_p0  ;;  %p1609_p6 = por %p48_p4, %p47_p3 }
  0x13   : > { %p123_p7 = scmp.eq.s32.totalorder %s1591_s19, 1  ;;  %p129_p8 = scmp.eq.s32.totalorder %s1158_s20, 1 }
  0x14   : > { %s1944_s25 = scalar_select %p1609_p6, 1, 0 }
  0x15   : > { %p1284_p10 = scmp.lt.s32.totalorder %s1532_s18, 2  ;;  %p1616_p11 = por %p123_p7, %p41_p0 }
  0x16   : > { %p1620_p12 = por %p129_p8, %p47_p3  ;;  %s175_s28 = sand.u32 1, %s1528_s17  }
  0x17   : > { %s1945_s26 = scalar_select %p1616_p11, 1, 0 }
  0x18   : > { %s1946_s27 = scalar_select %p1620_p12, 1, 0 }
  0x19   : > { %s1626_s29 = sshll.u32 %s1532_s18, 9  ;;  %s1630_s30 = sshll.u32 %s175_s28, 5 }
  0x1a   : > { %p1632_p13 = pnand %p1284_p10, %p43_p5  ;;  %s196_s6 = sand.u32 1, %s1532_s18  }
  0x1b   : > { %s1948_s1 = sld [smem:[#allocation16_spill]]  ;;  %s200_s10 = scalar_lea.vmem [#allocation5], %s1630_s30 }
  0x1c   : > { %s207_s11 = sshll.u32 %s200_s10, 4  ;;  %s1647_s12 = scalar_lea.sflag [#allocation6], %s196_s6  ;;  %s1644_s11 = int_to_ptr.vmem [resolvable:$true] %s207_s11 }
  0x1d   : > { %p1653_p2 = pneg %p1632_p13 }
  0x21   : > { %s1641_s9 = scalar_lea.hbm %s1948_s1, %s1626_s29  ;;  %s1345_s23 = scalar_lea.hbm %s1948_s1, 1024 }
  0x22   : > { %s1340_s13 = scalar_lea.hbm %s1641_s9, 512  ;;  %p1346_p5 = scmp.lt.u32.totalorder %s1641_s9, %s1948_s1 }
  0x23   : > { %p1341_p1 = scmp.ne.s32.totalorder %s1641_s9, %s1340_s13  ;;  %p1347_p7 = scmp.lt.u32.totalorder %s1345_s23, %s1340_s13 }
  0x24   : > { %p1349_p10 = scmp.lt.u32.totalorder %s1340_s13, %s1641_s9 }
  0x25   : > { %p1343_p3 = pnand %p1653_p2, %p1341_p1  ;;  %p1348_p8 = por %p1347_p7, %p1346_p5 }
  0x27   : > { %p1344_p4 = pneg %p1343_p3  ;;  %p1350_p9 = por %p1349_p10, %p1348_p8 }
  0x29   : > { %p1351_p0 = pnand %p1350_p9, %p1344_p4 }
  0x2b   : > { %1354 = shalt.err (!%p1351_p0)
}
  0x2c   : > { %s1355_s6 = scalar_lea.vmem %s1644_s11, 512  ;;  %s1534_s10 = smov [#allocation5]  }
  0x2d   : > { %p1356_p1 = scmp.ne.s32.totalorder %s1644_s11, %s1355_s6  ;;  %s1360_s20 = sshll.u32 %s1534_s10, 4  ;;  %s1361_s20 = int_to_ptr.vmem [resolvable:$false] %s1360_s20 }
  0x2e   : > { %s1362_s22 = scalar_lea.vmem %s1361_s20, 1024  ;;  %p1363_p11 = scmp.lt.s32.totalorder %s1644_s11, %s1361_s20 }
  0x2f   : > { %p1358_p3 = pnand %p1356_p1, %p1653_p2  ;;  %p1364_p6 = scmp.lt.s32.totalorder %s1362_s22, %s1355_s6 }
  0x31   : > { %p1359_p12 = pneg %p1358_p3  ;;  %p1365_p5 = por %p1364_p6, %p1363_p11 }
  0x33   : > { %p1366_p7 = pnand %p1365_p5, %p1359_p12 }
  0x35   : > { %1369 = shalt.err (!%p1366_p7)
}
  0x36   : > { %s1938_s13 = smov 128   ;;  %s1940_s23 = smov 8  }
  0x37   : > { %1273 = dma.hbm_to_vmem [thread:$0]  (!%p1632_p13), %s1641_s9, 512, %s1644_s11, %s1647_s12, %s1938_s13, %s1938_s13, %s1940_s23  }
  0x38   : > { %p236_p6 = scmp.lt.s32.totalorder %s1532_s18, 3  ;;  %s1950_s0 = sld [smem:[#allocation15_spill]] }
  0x39   : > { %p1951_p9 = scmp.ge.s32.totalorder %s1532_s18, 1  ;;  %s179_s20 = scalar_lea.vmem [#allocation2], %s1630_s30 }
  0x3a   : > { %s186_s22 = sshll.u32 %s179_s20, 4  ;;  %s1698_s9 = scalar_lea.sflag [#allocation3], %s175_s28  ;;  %s1694_s22 = int_to_ptr.vmem [resolvable:$true] %s186_s22 }
  0x3b   : > { %p1689_p11 = pnand %p1951_p9, %p236_p6 }
  0x3d   : > { %s1952_s10 = scalar_select %p1689_p11, 1, 0 }
  0x3e   : > { %s1685_s6 = scalar_lea.hbm %s1950_s0, %s1626_s29  ;;  %s1375_s13 = scalar_lea.hbm %s1950_s0, 1024 }
  0x3f   : > { %s1370_s11 = scalar_lea.hbm %s1685_s6, 512  ;;  %p1376_p8 = scmp.lt.u32.totalorder %s1685_s6, %s1950_s0 }
  0x40   : > { %p1371_p12 = scmp.ne.s32.totalorder %s1685_s6, %s1370_s11  ;;  %p1377_p10 = scmp.lt.u32.totalorder %s1375_s13, %s1370_s11 }
  0x41   : > { %p1379_p3 = scmp.lt.u32.totalorder %s1370_s11, %s1685_s6 }
  0x42   : > { %p1373_p0 = pnand %p1371_p12, %p1653_p2  ;;  %p1378_p1 = por %p1377_p10, %p1376_p8 }
  0x44   : > { %p1374_p4 = pneg %p1373_p0  ;;  %p1380_p5 = por %p1379_p3, %p1378_p1 }
  0x46   : > { %p1381_p7 = pnand %p1380_p5, %p1374_p4 }
  0x48   : > { %1384 = shalt.err (!%p1381_p7)
}
  0x49   : > { %s1385_s28 = scalar_lea.vmem %s1694_s22, 512  ;;  %s1537_s20 = smov [#allocation2]  }
  0x4a   : > { %p1386_p6 = scmp.ne.s32.totalorder %s1694_s22, %s1385_s28  ;;  %s1390_s7 = sshll.u32 %s1537_s20, 4  ;;  %s1391_s7 = int_to_ptr.vmem [resolvable:$false] %s1390_s7 }
  0x4b   : > { %s1392_s1 = scalar_lea.vmem %s1391_s7, 1024  ;;  %p1393_p0 = scmp.lt.s32.totalorder %s1694_s22, %s1391_s7 }
  0x4c   : > { %p1388_p9 = pnand %p1386_p6, %p1653_p2  ;;  %p1394_p11 = scmp.lt.s32.totalorder %s1392_s1, %s1385_s28 }
  0x4e   : > { %p1389_p12 = pneg %p1388_p9  ;;  %p1395_p8 = por %p1394_p11, %p1393_p0 }
  0x50   : > { %p1396_p10 = pnand %p1395_p8, %p1389_p12 }
  0x52   : > { %1399 = shalt.err (!%p1396_p10)
}
  0x53   : > { %s1953_s13 = smov 8   ;;  %s1954_s23 = smov 128  }
  0x54   : > { %1270 = dma.hbm_to_vmem [thread:$0]  (!%p1632_p13), %s1685_s6, 512, %s1694_s22, %s1698_s9, %s1954_s23, %s1954_s23, %s1953_s13  }
  0x55   : > { %s1729_s20 = scalar_lea.hbm %s1933_s2, %s1626_s29  ;;  %s221_s28 = scalar_lea.vmem [#allocation7], %s1630_s30 }
  0x56   : > { %s228_s7 = sshll.u32 %s221_s28, 4  ;;  %s1400_s1 = scalar_lea.hbm %s1729_s20, 512  ;;  %s1732_s7 = int_to_ptr.vmem [resolvable:$true] %s228_s7 }
  0x57   : > { %p1401_p11 = scmp.ne.s32.totalorder %s1729_s20, %s1400_s1  ;;  %s1405_s22 = scalar_lea.hbm %s1933_s2, 1024 }
  0x58   : > { %p1406_p3 = scmp.lt.u32.totalorder %s1729_s20, %s1933_s2  ;;  %p1407_p5 = scmp.lt.u32.totalorder %s1405_s22, %s1400_s1 }
  0x59   : > { %p1403_p4 = pnand %p1401_p11, %p1653_p2  ;;  %p1409_p6 = scmp.lt.u32.totalorder %s1400_s1, %s1729_s20 }
  0x5a   : > { %p1408_p7 = por %p1407_p5, %p1406_p3 }
  0x5b   : > { %p1404_p1 = pneg %p1403_p4 }
  0x5c   : > { %p1410_p9 = por %p1409_p6, %p1408_p7 }
  0x5e   : > { %p1411_p12 = pnand %p1410_p9, %p1404_p1 }
  0x60   : > { %1414 = shalt.err (!%p1411_p12)
}
  0x61   : > { %s1415_s30 = scalar_lea.vmem %s1732_s7, 512  ;;  %s1538_s0 = smov [#allocation7]  }
  0x62   : > { %p1416_p0 = scmp.ne.s32.totalorder %s1732_s7, %s1415_s30  ;;  %s1420_s11 = sshll.u32 %s1538_s0, 4  ;;  %s1421_s11 = int_to_ptr.vmem [resolvable:$false] %s1420_s11 }
  0x63   : > { %s1422_s8 = scalar_lea.vmem %s1421_s11, 1024  ;;  %p1423_p11 = scmp.lt.s32.totalorder %s1732_s7, %s1421_s11 }
  0x64   : > { %p1418_p8 = pnand %p1416_p0, %p1653_p2  ;;  %p1424_p4 = scmp.lt.s32.totalorder %s1422_s8, %s1415_s30 }
  0x66   : > { %p1419_p10 = pneg %p1418_p8  ;;  %p1425_p3 = por %p1424_p4, %p1423_p11 }
  0x68   : > { %p1426_p5 = pnand %p1425_p3, %p1419_p10 }
  0x6a   : > { %1429 = shalt.err (!%p1426_p5)
}
  0x6b   : > { %1276 = dma.hbm_to_vmem [thread:$0]  (!%p1632_p13), %s1729_s20, 512, %s1732_s7, %s1647_s12, %s1954_s23, %s1954_s23, %s1953_s13  }
  0x6c   : > { %p1955_p2 = scmp.ne.s32.totalorder %s1952_s10, 0 }
  0x6d   : > { %s1762_s14 = sand.u32 (!%p1955_p2), 1, %s1524_s16   ;;  %p1956_p1 = scmp.ne.s32.totalorder (!%p1955_p2), %s1944_s25, 0 }
  0x6e   : > { %240 = sbr.rel (%p1955_p2) target bundleno = 889 (0x379), region = 32  ;;  %s1765_s28 = sshll.u32 (!%p1955_p2), %s1762_s14, 5 }
  0x6f   : > { %s243_s5 = scalar_lea.sflag (!%p1955_p2), [#allocation3], %s1762_s14  ;;  %s1769_s1 = scalar_lea.vmem (!%p1955_p2), [#allocation2], %s1765_s28 }
  0x75   : > { %1503 = dma.done.wait (%p1956_p1), %s243_s5, 512  }
  0x76   : > { %1505 = vsyncadd (%p1956_p1), %s243_s5, 4294966784  ;;  %s251_s12 = sand.u32 1, %s1591_s19   ;;  %s255_s13 = scalar_lea.vmem [#allocation5], %s1765_s28 }
  0x77   : > { %s252_s10 = scalar_lea.sflag [#allocation6], %s251_s12 }
  0x78   : > { %1507 = dma.done.wait (%p1956_p1), %s252_s10, 1024  }
  0x79   : > { %1509 = vsyncadd (%p1956_p1), %s252_s10, 4294966272  ;;  %v1539_v0 = vmov 0.0   ;;  %vm1540_vm0 = vmmov 0   ;;  %vm321_vm1 = vcmask 261120   ;;  %v313_v1 = vld [vmem:[%s255_s13] sm:$0xff]  ;;  %v314_v2 = vld [vmem:[%s255_s13 + $0x8] sm:$0xff] }
  0x7a   : > { %1217 = vmatprep.subr.mxu0 %v1539_v0  ;;  %1219 = vmatprep.mubr.msk.f32.mxu0 %vm1540_vm0, %v1539_v0  ;;  %v309_v3 = vld [vmem:[%s1769_s1] sm:$0xff]  ;;  %v310_v4 = vld [vmem:[%s1769_s1 + $0x8] sm:$0xff]  ;;  %v315_v5 = vld [vmem:[%s255_s13 + $0x10] sm:$0xff]  ;;  %vm630_vm2 = vcmask 64512   ;;  %s264_s25 = scalar_lea.vmem [#allocation7], %s1765_s28  ;;  %s303_s23 = scalar_lea.vmem [#allocation9], %s1765_s28 }
  0x7b   : > { %1222 = vmatprep.subr.mxu1 %v1539_v0  ;;  %1224 = vmatprep.mubr.msk.f32.mxu1 %vm1540_vm0, %v1539_v0  ;;  %v316_v6 = vld [vmem:[%s255_s13 + $0x18] sm:$0xff]  ;;  %v311_v7 = vld [vmem:[%s1769_s1 + $0x10] sm:$0xff]  ;;  %v317_v45 = vld [vmem:[%s264_s25] sm:$0xff]  ;;  %s1199_s20 = sshll.u32 %s1591_s19, 9  ;;  %s1010_s9 = sshll.u32 %s303_s23, 4  ;;  %s1843_s9 = int_to_ptr.vmem [resolvable:$true] %s1010_s9 }
  0x7c   : > { %1218 = vmatpush3.xpose.msk.msra.mxu0 %vm321_vm1, %v313_v1  ;;  %1223 = vmatpush3.xpose.msk.msra.mxu1 %vm321_vm1, %v314_v2  ;;  %v312_v8 = vld [vmem:[%s1769_s1 + $0x18] sm:$0xff]  ;;  %v318_v46 = vld [vmem:[%s264_s25 + $0x8] sm:$0xff]  ;;  %v319_v53 = vld [vmem:[%s264_s25 + $0x10] sm:$0xff]  ;;  %s1841_s22 = scalar_lea.hbm %s1935_s4, %s1199_s20  ;;  %s981_s29 = scalar_lea.sflag [#allocation10], %s1762_s14 }
  0x7d   : > { %1227 = vmatprep.subr.mxu0 %v1539_v0  ;;  %1232 = vmatprep.subr.mxu1 %v1539_v0  ;;  %v320_v57 = vld [vmem:[%s264_s25 + $0x18] sm:$0xff]  ;;  %s1430_s30 = scalar_lea.vmem %s1843_s9, 512  ;;  %p1957_p7 = scmp.ne.s32.totalorder %s1945_s26, 0 }
  0x7e   : > { %p1431_p13 = scmp.ne.s32.totalorder %s1843_s9, %s1430_s30  ;;  %s1541_s0 = smov [#allocation9]  }
  0x7f   : > { %1220 = vmatmul.mubr.msk.f32.vlgmr.msra.gmra.mrb[0].mxu0 %vm321_vm1, %v309_v3  ;;  %1225 = vmatmul.mubr.msk.f32.vlgmr.msra.gmra.mrb[0].mxu1 %vm321_vm1, %v310_v4  ;;  %s1434_s11 = sshll.u32 %s1541_s0, 4  ;;  %s1435_s11 = int_to_ptr.vmem [resolvable:$false] %s1434_s11 }
  0x80   : > { %1228 = vmatpush3.xpose.msk.msra.mxu0 %vm321_vm1, %v315_v5  ;;  %1229 = vmatprep.mubr.msk.f32.mxu0 %vm1540_vm0, %v1539_v0  ;;  %p1432_p6 = pnand %p1431_p13, %p1957_p7  ;;  %s1436_s8 = scalar_lea.vmem %s1435_s11, 1024 }
  0x81   : > { %1233 = vmatpush3.xpose.msk.msra.mxu1 %vm321_vm1, %v316_v6  ;;  %1234 = vmatprep.mubr.msk.f32.mxu1 %vm1540_vm0, %v1539_v0  ;;  %p1437_p12 = scmp.lt.s32.totalorder %s1843_s9, %s1435_s11  ;;  %p1438_p0 = scmp.lt.s32.totalorder %s1436_s8, %s1430_s30 }
  0x82   : > { %1237 = vmatprep.subr.mxu0 %v1539_v0  ;;  %1242 = vmatprep.subr.mxu1 %v1539_v0  ;;  %p1433_p9 = pneg %p1432_p6 }
  0x83   : > { %1230 = vmatmul.mubr.msk.f32.vlgmr.msra.gmra.mrb[2].mxu0 %vm321_vm1, %v311_v7  ;;  %p1439_p8 = por %p1438_p0, %p1437_p12 }
  0x84   : > { %1235 = vmatmul.mubr.msk.f32.vlgmr.msra.gmra.mrb[2].mxu1 %vm321_vm1, %v312_v8  ;;  %1239 = vmatprep.mubr.msk.f32.mxu0 %vm1540_vm0, %v1539_v0 }
  0x85   : > { %1244 = vmatprep.mubr.msk.f32.mxu1 %vm1540_vm0, %v1539_v0  ;;  %1238 = vmatpush3.msra.mxu0 %v317_v45  ;;  %p1440_p10 = pnand %p1439_p8, %p1433_p9 }
  0x86   : > { %1247 = vmatprep.subr.mxu0 %v1539_v0  ;;  %1243 = vmatpush3.msra.mxu1 %v318_v46 }
  0x87   : > { %1252 = vmatprep.subr.mxu1 %v1539_v0 }
 0x152   : > { %v394_v9 = vpop.f32.mrb[0].mxu0  ;;  %v470_v10 = vpop.f32.mrb[0].mxu1 }
 0x153   : > { %v626_v11 = vmul.f32 0.17677669, %v394_v9  ;;  %v1221_v12 = vpop.f32.mrb[1].mxu0  ;;  %v627_v13 = vmul.f32 0.17677669, %v470_v10  ;;  %v1226_v14 = vpop.f32.mrb[1].mxu1 }
 0x155   : > { %v631_v15 = vsel %vm630_vm2, %v626_v11, -inf  ;;  %v634_v20 = vsel %vm630_vm2, %v627_v13, -inf }
 0x156   : > { %632 = vmax.xlane.f32.xlu0 %v631_v15  ;;  %v546_v16 = vpop.f32.mrb[2].mxu0 }
 0x157   : > { %v628_v17 = vmul.f32 0.17677669, %v546_v16  ;;  %v1231_v18 = vpop.f32.mrb[3].mxu0  ;;  %v622_v19 = vpop.f32.mrb[2].mxu1 }
 0x158   : > { %v629_v21 = vmul.f32 0.17677669, %v622_v19  ;;  %v1236_v22 = vpop.f32.mrb[3].mxu1 }
 0x159   : > { %v637_v23 = vsel %vm630_vm2, %v628_v17, -inf }
 0x15a   : > { %635 = vmax.xlane.f32.xlu0 %v634_v20  ;;  %638 = vmax.xlane.f32.xlu1 %v637_v23  ;;  %v640_v24 = vsel %vm630_vm2, %v629_v21, -inf }
 0x15e   : > { %641 = vmax.xlane.f32.xlu1 %v640_v24 }
 0x1e3   : > { %v633_v25 = vpop.xlane.xlu0 %632 }
 0x1e4   : > { %v643_v26 = vsub.f32 %v626_v11, %v633_v25 }
 0x1e6   : > { %v647_v27 = vmul.f32 1.442695, %v643_v26 }
 0x1e7   : > { %v636_v28 = vpop.xlane.xlu0 %635  ;;  %v639_v29 = vpop.xlane.xlu1 %638 }
 0x1e8   : > { %1324 = vpow2.f32 %v647_v27  ;;  %v644_v30 = vsub.f32 %v627_v13, %v636_v28  ;;  %v645_v31 = vsub.f32 %v628_v17, %v639_v29 }
 0x1ea   : > { %v649_v32 = vmul.f32 1.442695, %v644_v30  ;;  %v651_v33 = vmul.f32 1.442695, %v645_v31 }
 0x1eb   : > { %v642_v34 = vpop.xlane.xlu1 %641 }
 0x1ec   : > { %1326 = vpow2.f32 %v649_v32  ;;  %v646_v35 = vsub.f32 %v629_v21, %v642_v34 }
 0x1ed   : > { %1328 = vpow2.f32 %v651_v33 }
 0x1ee   : > { %v653_v36 = vmul.f32 1.442695, %v646_v35 }
 0x1f0   : > { %1330 = vpow2.f32 %v653_v36 }
 0x1f2   : > { %v1325_v37 = vpop.eup %1324 }
 0x1f3   : > { %v655_v38 = vsel %vm630_vm2, %v1325_v37, 0.0 }
 0x1f4   : > { %656 = vadd.xlane.f32.xlu0 %v655_v38 }
 0x1f6   : > { %v1327_v39 = vpop.eup %1326 }
 0x1f7   : > { %v1329_v40 = vpop.eup %1328  ;;  %v658_v41 = vsel %vm630_vm2, %v1327_v39, 0.0 }
 0x1f8   : > { %659 = vadd.xlane.f32.xlu1 %v658_v41  ;;  %v661_v42 = vsel %vm630_vm2, %v1329_v40, 0.0 }
 0x1f9   : > { %662 = vadd.xlane.f32.xlu0 %v661_v42 }
 0x1fa   : > { %v1331_v43 = vpop.eup %1330 }
 0x1fb   : > { %v664_v44 = vsel %vm630_vm2, %v1331_v43, 0.0 }
 0x1fc   : > { %665 = vadd.xlane.f32.xlu1 %v664_v44 }
 0x281   : > { %v657_v47 = vpop.xlane.xlu0 %656 }
 0x282   : > { %1332 = vrcp.f32 %v657_v47 }
 0x285   : > { %v660_v48 = vpop.xlane.xlu1 %659 }
 0x286   : > { %v663_v49 = vpop.xlane.xlu0 %662  ;;  %1334 = vrcp.f32 %v660_v48 }
 0x287   : > { %1336 = vrcp.f32 %v663_v49 }
 0x289   : > { %v666_v50 = vpop.xlane.xlu1 %665 }
 0x28a   : > { %1338 = vrcp.f32 %v666_v50 }
 0x28c   : > { %v1333_v51 = vpop.eup %1332 }
 0x28d   : > { %v671_v52 = vmul.f32 %v1333_v51, %v1325_v37 }
 0x28f   : > { %675 = vst.msk [vmem:[%s303_s23] sm:$0xff] %vm630_vm2, %v671_v52  ;;  %1240 = vmatmul.mubr.msk.f32.vlgmr.msra.gmra.mrb[4].mxu0 %vm630_vm2, %v671_v52 }
 0x290   : > { %v1335_v54 = vpop.eup %1334  ;;  %1248 = vmatpush3.msra.mxu0 %v319_v53  ;;  %1249 = vmatprep.mubr.msk.f32.mxu0 %vm1540_vm0, %v1539_v0 }
 0x291   : > { %v1337_v55 = vpop.eup %1336  ;;  %v672_v56 = vmul.f32 %v1335_v54, %v1327_v39 }
 0x292   : > { %v673_v58 = vmul.f32 %v1337_v55, %v1329_v40 }
 0x293   : > { %676 = vst.msk [vmem:[%s303_s23 + $0x8] sm:$0xff] %vm630_vm2, %v672_v56  ;;  %1245 = vmatmul.mubr.msk.f32.vlgmr.msra.gmra.mrb[4].mxu1 %vm630_vm2, %v672_v56 }
 0x294   : > { %v1339_v59 = vpop.eup %1338  ;;  %677 = vst.msk [vmem:[%s303_s23 + $0x10] sm:$0xff] %vm630_vm2, %v673_v58  ;;  %1250 = vmatmul.mubr.msk.f32.vlgmr.msra.gmra.mrb[6].mxu0 %vm630_vm2, %v673_v58  ;;  %1253 = vmatpush3.msra.mxu1 %v320_v57 }
 0x295   : > { %v674_v60 = vmul.f32 %v1339_v59, %v1331_v43  ;;  %1254 = vmatprep.mubr.msk.f32.mxu1 %vm1540_vm0, %v1539_v0 }
 0x297   : > { %678 = vst.msk [vmem:[%s303_s23 + $0x18] sm:$0xff] %vm630_vm2, %v674_v60  ;;  %1255 = vmatmul.mubr.msk.f32.vlgmr.msra.gmra.mrb[6].mxu1 %vm630_vm2, %v674_v60 }
 0x298   : > { %1443 = shalt.err (!%p1440_p10)
}
 0x299   : > { %s1444_s5 = scalar_lea.hbm %s1841_s22, 512  ;;  %s1448_s10 = scalar_lea.hbm %s1935_s4, 1024 }
 0x29a   : > { %p1445_p11 = scmp.ne.s32.totalorder %s1841_s22, %s1444_s5  ;;  %p1449_p5 = scmp.lt.u32.totalorder %s1841_s22, %s1935_s4 }
 0x29b   : > { %p1450_p2 = scmp.lt.u32.totalorder %s1448_s10, %s1444_s5  ;;  %p1452_p13 = scmp.lt.u32.totalorder %s1444_s5, %s1841_s22 }
 0x29c   : > { %p1446_p4 = pnand %p1445_p11, %p1957_p7 }
 0x29d   : > { %p1451_p1 = por %p1450_p2, %p1449_p5 }
 0x29e   : > { %p1447_p3 = pneg %p1446_p4 }
 0x29f   : > { %p1453_p6 = por %p1452_p13, %p1451_p1 }
 0x2a1   : > { %p1454_p9 = pnand %p1453_p6, %p1447_p3 }
 0x2a3   : > { %1457 = shalt.err (!%p1454_p9)
}
 0x2a4   : > { %s1542_s23 = smov 128   ;;  %s1543_s7 = smov 8  }
 0x2a5   : > { %1264 = dma.vmem_to_hbm [thread:$0]  (%p1957_p7), %s1843_s9, 512, %s1841_s22, %s981_s29, %s1542_s23, %s1542_s23, %s1543_s7  }
 0x2a6   : > { %s296_s6 = scalar_lea.vmem [#allocation8], %s1765_s28  ;;  %s1883_s9 = scalar_lea.hbm %s1934_s3, %s1199_s20 }
 0x2a7   : > { %s994_s30 = sshll.u32 %s296_s6, 4  ;;  %s976_s29 = scalar_lea.sflag [#allocation4], %s1762_s14  ;;  %s1875_s30 = int_to_ptr.vmem [resolvable:$true] %s994_s30 }
 0x2a8   : > { %s1458_s0 = scalar_lea.vmem %s1875_s30, 512  ;;  %s1544_s11 = smov [#allocation8]  }
 0x2a9   : > { %p1459_p12 = scmp.ne.s32.totalorder %s1875_s30, %s1458_s0  ;;  %s1462_s8 = sshll.u32 %s1544_s11, 4  ;;  %s1463_s8 = int_to_ptr.vmem [resolvable:$false] %s1462_s8 }
 0x2aa   : > { %s1464_s5 = scalar_lea.vmem %s1463_s8, 1024  ;;  %p1465_p10 = scmp.lt.s32.totalorder %s1875_s30, %s1463_s8 }
 0x2ab   : > { %p1460_p0 = pnand %p1459_p12, %p1957_p7  ;;  %p1466_p11 = scmp.lt.s32.totalorder %s1464_s5, %s1458_s0 }
 0x2ad   : > { %p1461_p8 = pneg %p1460_p0  ;;  %p1467_p4 = por %p1466_p11, %p1465_p10 }
 0x2af   : > { %p1468_p3 = pnand %p1467_p4, %p1461_p8 }
 0x362   : > { %v748_v61 = vpop.f32.mrb[4].mxu0 }
 0x363   : > { %971 = vst.msk [vmem:[%s296_s6] sm:$0xff] %vm321_vm1, %v748_v61  ;;  %v1241_v62 = vpop.f32.mrb[5].mxu0 }
 0x366   : > { %v821_v63 = vpop.f32.mrb[4].mxu1 }
 0x367   : > { %972 = vst.msk [vmem:[%s296_s6 + $0x8] sm:$0xff] %vm321_vm1, %v821_v63  ;;  %v894_v0 = vpop.f32.mrb[6].mxu0  ;;  %v1246_v1 = vpop.f32.mrb[5].mxu1 }
 0x368   : > { %973 = vst.msk [vmem:[%s296_s6 + $0x10] sm:$0xff] %vm321_vm1, %v894_v0  ;;  %v1251_v2 = vpop.f32.mrb[7].mxu0 }
 0x36a   : > { %v967_v3 = vpop.f32.mrb[6].mxu1 }
 0x36b   : > { %974 = vst.msk [vmem:[%s296_s6 + $0x18] sm:$0xff] %vm321_vm1, %v967_v3  ;;  %v1256_v4 = vpop.f32.mrb[7].mxu1 }
 0x36c   : > { %1471 = shalt.err (!%p1468_p3)
}
 0x36d   : > { %s1472_s19 = scalar_lea.hbm %s1883_s9, 512  ;;  %s1476_s12 = scalar_lea.hbm %s1934_s3, 1024 }
 0x36e   : > { %p1473_p5 = scmp.ne.s32.totalorder %s1883_s9, %s1472_s19  ;;  %p1477_p13 = scmp.lt.u32.totalorder %s1883_s9, %s1934_s3 }
 0x36f   : > { %p1478_p6 = scmp.lt.u32.totalorder %s1476_s12, %s1472_s19  ;;  %p1480_p12 = scmp.lt.u32.totalorder %s1472_s19, %s1883_s9 }
 0x370   : > { %p1474_p2 = pnand %p1473_p5, %p1957_p7 }
 0x371   : > { %p1479_p9 = por %p1478_p6, %p1477_p13 }
 0x372   : > { %p1475_p1 = pneg %p1474_p2 }
 0x373   : > { %p1481_p0 = por %p1480_p12, %p1479_p9 }
 0x375   : > { %p1482_p8 = pnand %p1481_p0, %p1475_p1 }
 0x377   : > { %1485 = shalt.err (!%p1482_p8)
}
 0x378   : > { %1263 = dma.vmem_to_hbm [thread:$0]  (%p1957_p7), %s1875_s30, 512, %s1883_s9, %s976_s29, %s1542_s23, %s1542_s23, %s1543_s7  }
 0x379 PF: > { %s1025_s25 = sand.u32 1, %s1520_s15   ;;  %p1958_p10 = scmp.ne.s32.totalorder %s1946_s27, 0 }
 0x37a   : > { %p1959_p11 = scmp.ge.s32.totalorder %s1532_s18, 2  ;;  %s1026_s6 = scalar_lea.sflag [#allocation4], %s1025_s25 }
 0x37c   : > { %p1278_p4 = pnand %p1959_p11, %p1958_p10 }
 0x37e   : > { %1511 = dma.done.wait (!%p1278_p4), %s1026_s6, 512  }
 0x37f   : > { %1513 = vsyncadd (!%p1278_p4), %s1026_s6, 4294966784  ;;  %s1035_s26 = scalar_lea.sflag [#allocation10], %s1025_s25 }
 0x380   : > { %1515 = dma.done.wait (!%p1278_p4), %s1035_s26, 512  }
 0x381   : > { %1517 = vsyncadd (!%p1278_p4), %s1035_s26, 4294966784  ;;  %p24_p7 = scmp.ge.s32.totalorder %s1595_s21, 4   ;;  %s1960_s15 = smov %s1524_s16 }
 0x382   : > { %s1961_s16 = smov %s1528_s17  ;;  %s1962_s17 = smov %s1607_s24 }
 0x383   : > { %s1963_s18 = smov %s1595_s21  ;;  %26 = sbr.rel (!%p24_p7) target bundleno = 12 (0xc), region = 118 }
 0x38a   :  { %1040 = vsyncpa [#allocation3], 1 }
 0x38b   :  { %1042 = vsyncpa [#allocation3 + $0x1], 1 }
 0x38c   :  { %1043 = vsyncpa [#allocation6], 1 }
 0x38d   :  { %1045 = vsyncpa [#allocation6 + $0x1], 1 }
 0x38e   :  { %1046 = vsyncpa [#allocation4], 1 }
 0x38f   :  { %1048 = vsyncpa [#allocation4 + $0x1], 1 }
 0x390   :  { %1049 = vsyncpa [#allocation10], 1 }
 0x391   :  { %1051 = vsyncpa [#allocation10 + $0x1], 1 }

</bundles_post_ra>
